<compile_context>
chip_gen: v5e
topology: v5e:2x2
jax: 0.10.0
libtpu: 0.0.40
codegen_flags: <defaults>
</compile_context>

<pallas_src>
import functools

import jax
import jax.numpy as jnp
import numpy as np
from jax.experimental import pallas as pl
from jax.experimental.pallas import tpu as pltpu  # noqa: F401  (VMEM spaces etc.)

OBS_DIM = 25
ACTION_DIM = 4
HIDDEN_DIM = 64
OUT_LANES = 128  # lane-dense output slab width


def _rnn_policy_kernel(x_ref, wih_ref, whh_ref, b_ref, wfc_ref, bfc_ref,
                       out_ref, *, T, Bp):
    # x_ref: (T*Bp, Dp) time-major, flattened in the wrapper (no in-kernel reshape).
    H = whh_ref.shape[0]

    # Hoisted input projection: one GEMM over all timesteps, kept as a value
    # (T*Bp*H*4 = 16 KB -> lives in the vreg file, no VMEM scratch round-trip).
    xw = jnp.dot(x_ref[...], wih_ref[...],
                 preferred_element_type=jnp.float32) + b_ref[...]

    whh = whh_ref[...]  # (H, H), loop-invariant

    # Initial hidden state is zeros (PyTorch hidden=None), so step 0's
    # h @ W_hh^T is identically zero and is skipped.
    h = jnp.tanh(xw[0:Bp, :])
    for t in range(1, T):  # fully unrolled, static slices on a value
        pre = xw[t * Bp:(t + 1) * Bp, :] + jnp.dot(
            h, whh, preferred_element_type=jnp.float32)
        h = jnp.tanh(pre)

    act = jnp.tanh(jnp.dot(h, wfc_ref[...],
                           preferred_element_type=jnp.float32) + bfc_ref[...])

    # One lane-dense (Bp, 128) store: [hidden | tanh(fc-padded)].
    out_ref[...] = jnp.concatenate([h, act], axis=1)


def prepare_params(params):
    """One-time parameter preprocessing: transpose, pad, pre-sum biases, cast.

    Hoisted out of the per-call path so per-call XLA work on static weights
    doesn't rival the ~1-2 us kernel.
    """
    H, D = params["w_ih"].shape
    A = params["w_fc"].shape[0]
    Dp = ((D + 7) // 8) * 8                      # 25 -> 32: full sublane tiles
    assert H < OUT_LANES and A <= OUT_LANES - H
    FCW = OUT_LANES - H                           # fc output padded width

    wih_p = jnp.zeros((Dp, H), jnp.float32).at[:D, :].set(
        jnp.transpose(params["w_ih"]).astype(jnp.float32))          # (Dp, H)
    whh_t = jnp.transpose(params["w_hh"]).astype(jnp.float32)       # (H, H)
    b_rnn = (params["b_ih"] + params["b_hh"]).reshape(1, H).astype(jnp.float32)
    wfc_p = jnp.zeros((H, FCW), jnp.float32).at[:, :A].set(
        jnp.transpose(params["w_fc"]).astype(jnp.float32))          # (H, FCW)
    bfc_p = jnp.zeros((1, FCW), jnp.float32).at[:, :A].set(
        params["b_fc"].astype(jnp.float32))                         # (1, FCW)

    return {"w_ih": wih_p, "w_hh": whh_t, "b_rnn": b_rnn,
            "w_fc": wfc_p, "b_fc": bfc_p}


@functools.partial(jax.jit, static_argnames=("action_dim",))
def rnn_policy_forward(x, prep, action_dim=ACTION_DIM):
    """x: (B, T, obs_dim) float32.  Returns (action (B, A), hidden (1, B, H))."""
    B, T, D = x.shape
    H = prep["w_hh"].shape[0]
    Dp = prep["w_ih"].shape[0]
    FCW = prep["w_fc"].shape[1]
    A = action_dim

    # Pad batch to a multiple of 8 (f32 sublane tile) and D to Dp so every
    # MXU operand / store is full-tile and unmasked.
    Bp = ((B + 7) // 8) * 8
    xp = jnp.pad(x.astype(jnp.float32), ((0, Bp - B), (0, 0), (0, Dp - D)))
    x_flat = jnp.transpose(xp, (1, 0, 2)).reshape(T * Bp, Dp)   # time-major, flat

    flops = 2 * (T * Bp * Dp * H + (T - 1) * Bp * H * H + Bp * H * FCW)
    transcendentals = T * Bp * H + Bp * FCW
    bytes_accessed = 4 * (T * Bp * Dp + Dp * H + H * H + H
                          + H * FCW + FCW + Bp * OUT_LANES)

    kernel = functools.partial(_rnn_policy_kernel, T=T, Bp=Bp)
    out = pl.pallas_call(
        kernel,
        out_shape=jax.ShapeDtypeStruct((Bp, OUT_LANES), jnp.float32),
        # No grid: single invocation, whole arrays resident in VMEM.
        cost_estimate=pl.CostEstimate(flops=flops,
                                      transcendentals=transcendentals,
                                      bytes_accessed=bytes_accessed),
    )(x_flat, prep["w_ih"], prep["w_hh"], prep["b_rnn"],
      prep["w_fc"], prep["b_fc"])

    hidden = out[:B, :H]
    action = out[:B, H:H + A]
    return action, hidden[None, :, :]   # match PyTorch (num_layers=1, B, H)


def init_params(key, obs_dim=OBS_DIM, action_dim=ACTION_DIM, hidden_dim=HIDDEN_DIM):
    ks = jax.random.split(key, 6)
    s = 1.0 / np.sqrt(hidden_dim)
    u = lambda k, shape: jax.random.uniform(k, shape, jnp.float32, -s, s)
    return {
        "w_ih": u(ks[0], (hidden_dim, obs_dim)),
        "w_hh": u(ks[1], (hidden_dim, hidden_dim)),
        "b_ih": u(ks[2], (hidden_dim,)),
        "b_hh": u(ks[3], (hidden_dim,)),
        "w_fc": u(ks[4], (action_dim, hidden_dim)),
        "b_fc": u(ks[5], (action_dim,)),
    }


def _reference_forward(x, params):
    """Pure-JAX reference mirroring torch semantics (hidden=None -> zeros)."""
    B, T, D = x.shape
    H = params["w_hh"].shape[0]
    h = jnp.zeros((B, H), jnp.float32)
    for t in range(T):
        pre = (x[:, t, :] @ params["w_ih"].T + params["b_ih"]
               + h @ params["w_hh"].T + params["b_hh"])
        h = jnp.tanh(pre)
    action = jnp.tanh(h @ params["w_fc"].T + params["b_fc"])
    return action, h[None, :, :]


if __name__ == "__main__":
    key = jax.random.PRNGKey(0)
    k_p, k_x = jax.random.split(key)
    params = init_params(k_p)
    prep = prepare_params(params)          # one-time weight preprocessing

    B, T = 8, 8
    x = jax.random.normal(k_x, (B, T, OBS_DIM), jnp.float32)

    action, hidden = rnn_policy_forward(x, prep)
    jax.block_until_ready((action, hidden))

    ref_action, ref_hidden = _reference_forward(x, params)
    assert np.allclose(np.asarray(action), np.asarray(ref_action), atol=1e-5)
    assert np.allclose(np.asarray(hidden), np.asarray(ref_hidden), atol=1e-5)

    print("KERNEL_OK")
</pallas_src>

<mosaic_0001>
module attributes {stable_mosaic.version = 11 : i64} {
  func.func @_rnn_policy_kernel(%arg0: memref<64x32xf32, #tpu.memory_space<vmem>>, %arg1: memref<32x64xf32, #tpu.memory_space<vmem>>, %arg2: memref<64x64xf32, #tpu.memory_space<vmem>>, %arg3: memref<1x64xf32, #tpu.memory_space<vmem>>, %arg4: memref<64x64xf32, #tpu.memory_space<vmem>>, %arg5: memref<1x64xf32, #tpu.memory_space<vmem>>, %arg6: memref<8x128xf32, #tpu.memory_space<vmem>>) attributes {dimension_semantics = [], scalar_prefetch = 0 : i64, scratch_operands = 0 : i64, tpu.core_type = #tpu.core_type<tc>} {
    %c0 = arith.constant 0 : index
    %c0_0 = arith.constant 0 : index
    %0 = vector.load %arg0[%c0, %c0_0] : memref<64x32xf32, #tpu.memory_space<vmem>>, vector<64x32xf32>
    %c0_1 = arith.constant 0 : index
    %c0_2 = arith.constant 0 : index
    %1 = vector.load %arg1[%c0_1, %c0_2] : memref<32x64xf32, #tpu.memory_space<vmem>>, vector<32x64xf32>
    %cst = arith.constant dense<0.000000e+00> : vector<64x64xf32>
    %2 = tpu.matmul %0, %1, %cst {dimension_numbers = #tpu.dot_dimension_numbers<[1], [0], [0], [1], [0, 0, 1, 1], [], []>} : vector<64x32xf32>, vector<32x64xf32>, vector<64x64xf32> -> vector<64x64xf32>
    %c0_3 = arith.constant 0 : index
    %c0_4 = arith.constant 0 : index
    %3 = vector.load %arg3[%c0_3, %c0_4] : memref<1x64xf32, #tpu.memory_space<vmem>>, vector<1x64xf32>
    %4 = vector.broadcast %3 : vector<1x64xf32> to vector<64x64xf32>
    %5 = arith.addf %2, %4 : vector<64x64xf32>
    %c0_5 = arith.constant 0 : index
    %c0_6 = arith.constant 0 : index
    %6 = vector.load %arg2[%c0_5, %c0_6] : memref<64x64xf32, #tpu.memory_space<vmem>>, vector<64x64xf32>
    %7 = vector.extract_strided_slice %5 {offsets = [0, 0], sizes = [8, 64], strides = [1, 1]} : vector<64x64xf32> to vector<8x64xf32>
    %8 = math.tanh %7 : vector<8x64xf32>
    %9 = vector.extract_strided_slice %5 {offsets = [8, 0], sizes = [8, 64], strides = [1, 1]} : vector<64x64xf32> to vector<8x64xf32>
    %cst_7 = arith.constant dense<0.000000e+00> : vector<8x64xf32>
    %10 = tpu.matmul %8, %6, %cst_7 {dimension_numbers = #tpu.dot_dimension_numbers<[1], [0], [0], [1], [0, 0, 1, 1], [], []>} : vector<8x64xf32>, vector<64x64xf32>, vector<8x64xf32> -> vector<8x64xf32>
    %11 = arith.addf %9, %10 : vector<8x64xf32>
    %12 = math.tanh %11 : vector<8x64xf32>
    %13 = vector.extract_strided_slice %5 {offsets = [16, 0], sizes = [8, 64], strides = [1, 1]} : vector<64x64xf32> to vector<8x64xf32>
    %cst_8 = arith.constant dense<0.000000e+00> : vector<8x64xf32>
    %14 = tpu.matmul %12, %6, %cst_8 {dimension_numbers = #tpu.dot_dimension_numbers<[1], [0], [0], [1], [0, 0, 1, 1], [], []>} : vector<8x64xf32>, vector<64x64xf32>, vector<8x64xf32> -> vector<8x64xf32>
    %15 = arith.addf %13, %14 : vector<8x64xf32>
    %16 = math.tanh %15 : vector<8x64xf32>
    %17 = vector.extract_strided_slice %5 {offsets = [24, 0], sizes = [8, 64], strides = [1, 1]} : vector<64x64xf32> to vector<8x64xf32>
    %cst_9 = arith.constant dense<0.000000e+00> : vector<8x64xf32>
    %18 = tpu.matmul %16, %6, %cst_9 {dimension_numbers = #tpu.dot_dimension_numbers<[1], [0], [0], [1], [0, 0, 1, 1], [], []>} : vector<8x64xf32>, vector<64x64xf32>, vector<8x64xf32> -> vector<8x64xf32>
    %19 = arith.addf %17, %18 : vector<8x64xf32>
    %20 = math.tanh %19 : vector<8x64xf32>
    %21 = vector.extract_strided_slice %5 {offsets = [32, 0], sizes = [8, 64], strides = [1, 1]} : vector<64x64xf32> to vector<8x64xf32>
    %cst_10 = arith.constant dense<0.000000e+00> : vector<8x64xf32>
    %22 = tpu.matmul %20, %6, %cst_10 {dimension_numbers = #tpu.dot_dimension_numbers<[1], [0], [0], [1], [0, 0, 1, 1], [], []>} : vector<8x64xf32>, vector<64x64xf32>, vector<8x64xf32> -> vector<8x64xf32>
    %23 = arith.addf %21, %22 : vector<8x64xf32>
    %24 = math.tanh %23 : vector<8x64xf32>
    %25 = vector.extract_strided_slice %5 {offsets = [40, 0], sizes = [8, 64], strides = [1, 1]} : vector<64x64xf32> to vector<8x64xf32>
    %cst_11 = arith.constant dense<0.000000e+00> : vector<8x64xf32>
    %26 = tpu.matmul %24, %6, %cst_11 {dimension_numbers = #tpu.dot_dimension_numbers<[1], [0], [0], [1], [0, 0, 1, 1], [], []>} : vector<8x64xf32>, vector<64x64xf32>, vector<8x64xf32> -> vector<8x64xf32>
    %27 = arith.addf %25, %26 : vector<8x64xf32>
    %28 = math.tanh %27 : vector<8x64xf32>
    %29 = vector.extract_strided_slice %5 {offsets = [48, 0], sizes = [8, 64], strides = [1, 1]} : vector<64x64xf32> to vector<8x64xf32>
    %cst_12 = arith.constant dense<0.000000e+00> : vector<8x64xf32>
    %30 = tpu.matmul %28, %6, %cst_12 {dimension_numbers = #tpu.dot_dimension_numbers<[1], [0], [0], [1], [0, 0, 1, 1], [], []>} : vector<8x64xf32>, vector<64x64xf32>, vector<8x64xf32> -> vector<8x64xf32>
    %31 = arith.addf %29, %30 : vector<8x64xf32>
    %32 = math.tanh %31 : vector<8x64xf32>
    %33 = vector.extract_strided_slice %5 {offsets = [56, 0], sizes = [8, 64], strides = [1, 1]} : vector<64x64xf32> to vector<8x64xf32>
    %cst_13 = arith.constant dense<0.000000e+00> : vector<8x64xf32>
    %34 = tpu.matmul %32, %6, %cst_13 {dimension_numbers = #tpu.dot_dimension_numbers<[1], [0], [0], [1], [0, 0, 1, 1], [], []>} : vector<8x64xf32>, vector<64x64xf32>, vector<8x64xf32> -> vector<8x64xf32>
    %35 = arith.addf %33, %34 : vector<8x64xf32>
    %36 = math.tanh %35 : vector<8x64xf32>
    %c0_14 = arith.constant 0 : index
    %c0_15 = arith.constant 0 : index
    %37 = vector.load %arg4[%c0_14, %c0_15] : memref<64x64xf32, #tpu.memory_space<vmem>>, vector<64x64xf32>
    %cst_16 = arith.constant dense<0.000000e+00> : vector<8x64xf32>
    %38 = tpu.matmul %36, %37, %cst_16 {dimension_numbers = #tpu.dot_dimension_numbers<[1], [0], [0], [1], [0, 0, 1, 1], [], []>} : vector<8x64xf32>, vector<64x64xf32>, vector<8x64xf32> -> vector<8x64xf32>
    %c0_17 = arith.constant 0 : index
    %c0_18 = arith.constant 0 : index
    %39 = vector.load %arg5[%c0_17, %c0_18] : memref<1x64xf32, #tpu.memory_space<vmem>>, vector<1x64xf32>
    %40 = vector.broadcast %39 : vector<1x64xf32> to vector<8x64xf32>
    %41 = arith.addf %38, %40 : vector<8x64xf32>
    %42 = math.tanh %41 : vector<8x64xf32>
    %43 = tpu.concatenate %36, %42 in 1 : vector<8x64xf32>, vector<8x64xf32> -> vector<8x128xf32>
    %c0_19 = arith.constant 0 : index
    %c0_20 = arith.constant 0 : index
    %44 = vector.load %arg6[%c0_19, %c0_20] : memref<8x128xf32, #tpu.memory_space<vmem>>, vector<8x128xf32>
    tpu.vector_store %arg6[%c0_19, %c0_20], %43 {strides = array<i32>} : memref<8x128xf32, #tpu.memory_space<vmem>>, vector<8x128xf32>,
    return
  }
}

</mosaic_0001>

<bundles_post_ra>
// kernel: rnn_policy_forward.1
= control target key start
LH: loop header
LB: loop body
LE: loop exit
PB: predicated region body
PF: predicated region fallthrough
CT: control target
= control target key end

     0   :  { %vm39_vm0 = vcmask 261120   ;;  %vm114_vm1 = vcmask 523264   ;;  %s377_s26 = smov 64   ;;  %s560_s1 = inlined_call_operand.vmem [shape: f32[32,64], index: 1, kind: input, shape index: {}]   ;;  %s561_s2 = inlined_call_operand.vmem [shape: f32[64,64], index: 2, kind: input, shape index: {}]   ;;  %s562_s3 = inlined_call_operand.vmem [shape: f32[1,64], index: 3, kind: input, shape index: {}]   ;;  %s563_s0 = inlined_call_operand.vmem [shape: f32[64,32], index: 0, kind: input, shape index: {}]   ;;  %s564_s4 = inlined_call_operand.vmem [shape: f32[64,64], index: 4, kind: input, shape index: {}]   ;;  %s565_s5 = inlined_call_operand.vmem [shape: f32[1,64], index: 5, kind: input, shape index: {}]   ;;  %s566_s6 = inlined_call_operand.vmem [shape: f32[8,128], index: 6, kind: output, shape index: {}]  }
   0x1   :  { %v34_v0 = vld [vmem:[%s560_s1 + $0x18] sm:$0xff]  ;;  %v33_v1 = vld [vmem:[%s560_s1 + $0x10] sm:$0xff]  ;;  %v32_v3 = vld [vmem:[%s560_s1 + $0x8] sm:$0xff] }
   0x2   :  { %76 = vmatpush.msra.mxu0 %v34_v0  ;;  %v422_v2 = vld [vmem:[%s561_s2 + $0x38] sm:$0xff]  ;;  %352 = vmatpush.msra.mxu3 %v34_v0  ;;  %v431_v4 = vld [vmem:[%s561_s2 + $0x30] sm:$0xff]  ;;  %v437_v5 = vld [vmem:[%s561_s2 + $0x28] sm:$0xff] }
   0x3   :  { %126 = vmatpush.msra.mxu1 %v422_v2  ;;  %151 = vmatpush.msra.mxu2 %v422_v2  ;;  %v31_v6 = vld [vmem:[%s560_s1] sm:$0xff]  ;;  %v108_v9 = vld [vmem:[%s561_s2 + $0x18] sm:$0xff]  ;;  %v107_v10 = vld [vmem:[%s561_s2 + $0x10] sm:$0xff] }
   0x4   :  { %77 = vmatpush.msra.mxu0 %v33_v1  ;;  %353 = vmatpush.msra.mxu3 %v33_v1  ;;  %v23_v7 = vld [vmem:[%s563_s0] sm:$0xff]  ;;  %v24_v11 = vld [vmem:[%s563_s0 + $0x8] sm:$0xff]  ;;  %v25_v18 = vld [vmem:[%s563_s0 + $0x10] sm:$0xff] }
   0x5   :  { %127 = vmatpush.msra.mxu1 %v431_v4  ;;  %152 = vmatpush.msra.mxu2 %v431_v4  ;;  %v109_v8 = vld [vmem:[%s561_s2 + $0x20] sm:$0xff]  ;;  %v106_v12 = vld [vmem:[%s561_s2 + $0x8] sm:$0xff]  ;;  %v29_v19 = vld [vmem:[%s563_s0 + $0x30] sm:$0xff] }
   0x6   :  { %78 = vmatpush.msra.mxu0 %v32_v3  ;;  %354 = vmatpush.msra.mxu3 %v32_v3  ;;  %v105_v13 = vld [vmem:[%s561_s2] sm:$0xff]  ;;  %v30_v25 = vld [vmem:[%s563_s0 + $0x38] sm:$0xff]  ;;  %v28_v40 = vld [vmem:[%s563_s0 + $0x28] sm:$0xff] }
   0x7   :  { %128 = vmatpush.msra.mxu1 %v437_v5  ;;  %153 = vmatpush.msra.mxu2 %v437_v5  ;;  %v481_v14 = vld [vmem:[%s562_s3] ss:$0 sm:$0xff]  ;;  %v26_v26 = vld [vmem:[%s563_s0 + $0x18] sm:$0xff]  ;;  %v296_v52 = vld [vmem:[%s564_s4 + $0x30] sm:$0xff] }
   0x8   :  { %79 = vmatpush.msra.mxu0 %v31_v6  ;;  %355 = vmatpush.msra.mxu3 %v31_v6  ;;  %v27_v32 = vld [vmem:[%s563_s0 + $0x20] sm:$0xff]  ;;  %v297_v51 = vld [vmem:[%s564_s4 + $0x38] sm:$0xff]  ;;  %v295_v53 = vld [vmem:[%s564_s4 + $0x28] sm:$0xff] }
   0x9   :  { %336 = vmatmul.msk.f32.vlgmr.msra.gmra.mxu0 %vm39_vm0, %v23_v7  ;;  %129 = vmatpush.msra.mxu1 %v109_v8  ;;  %v294_v58 = vld [vmem:[%s564_s4 + $0x20] sm:$0xff]  ;;  %v293_v59 = vld [vmem:[%s564_s4 + $0x18] sm:$0xff]  ;;  %v292_v60 = vld [vmem:[%s564_s4 + $0x10] sm:$0xff] }
   0xa   :  { %176 = vmatpush.msrb.mxu3 %v422_v2  ;;  %154 = vmatpush.msra.mxu2 %v109_v8  ;;  %v291_v61 = vld [vmem:[%s564_s4 + $0x8] sm:$0xff]  ;;  %v290_v62 = vld [vmem:[%s564_s4] sm:$0xff] }
   0xb   :  { %130 = vmatpush.msra.mxu1 %v108_v9  ;;  %342 = vmatmul.msk.f32.vlgmr.msra.gmra.mxu3 %vm39_vm0, %v29_v19  ;;  %v358_v3 = vld [vmem:[%s565_s5] ss:$0 sm:$0xff] }
   0xc   :  { %177 = vmatpush.msrb.mxu3 %v431_v4  ;;  %155 = vmatpush.msra.mxu2 %v108_v9 }
   0xd   :  { %131 = vmatpush.msra.mxu1 %v107_v10 }
   0xe   :  { %178 = vmatpush.msrb.mxu3 %v437_v5  ;;  %156 = vmatpush.msra.mxu2 %v107_v10 }
   0xf   :  { %132 = vmatpush.msra.mxu1 %v106_v12 }
  0x10   :  { %179 = vmatpush.msrb.mxu3 %v109_v8  ;;  %157 = vmatpush.msra.mxu2 %v106_v12 }
  0x11   :  { %337 = vmatmul.msk.f32.gmra.mxu0 %vm39_vm0, %v24_v11  ;;  %133 = vmatpush.msra.mxu1 %v105_v13 }
  0x12   :  { %180 = vmatpush.msrb.mxu3 %v108_v9  ;;  %158 = vmatpush.msra.mxu2 %v105_v13 }
  0x13   :  { %201 = vmatpush.msrb.mxu1 %v422_v2  ;;  %343 = vmatmul.msk.f32.gmra.mxu3 %vm39_vm0, %v30_v25 }
  0x14   :  { %181 = vmatpush.msrb.mxu3 %v107_v10  ;;  %226 = vmatpush.msrb.mxu2 %v422_v2 }
  0x15   :  { %202 = vmatpush.msrb.mxu1 %v431_v4 }
  0x16   :  { %182 = vmatpush.msrb.mxu3 %v106_v12  ;;  %227 = vmatpush.msrb.mxu2 %v431_v4 }
  0x17   :  { %203 = vmatpush.msrb.mxu1 %v437_v5 }
  0x18   :  { %183 = vmatpush.msrb.mxu3 %v105_v13  ;;  %228 = vmatpush.msrb.mxu2 %v437_v5 }
  0x19   :  { %204 = vmatpush.msrb.mxu1 %v109_v8  ;;  %338 = vmatmul.msk.f32.gmra.mxu0 %vm39_vm0, %v25_v18 }
  0x1a   :  { %229 = vmatpush.msrb.mxu2 %v109_v8  ;;  %251 = vmatpush.msra.mxu3 %v422_v2 }
  0x1b   :  { %205 = vmatpush.msrb.mxu1 %v108_v9 }
  0x1c   :  { %230 = vmatpush.msrb.mxu2 %v108_v9  ;;  %252 = vmatpush.msra.mxu3 %v431_v4 }
  0x1d   :  { %206 = vmatpush.msrb.mxu1 %v107_v10 }
  0x1e   :  { %231 = vmatpush.msrb.mxu2 %v107_v10  ;;  %253 = vmatpush.msra.mxu3 %v437_v5 }
  0x1f   :  { %207 = vmatpush.msrb.mxu1 %v106_v12 }
  0x20   :  { %232 = vmatpush.msrb.mxu2 %v106_v12  ;;  %254 = vmatpush.msra.mxu3 %v109_v8 }
  0x21   :  { %208 = vmatpush.msrb.mxu1 %v105_v13  ;;  %339 = vmatmul.msk.f32.gmra.mxu0 %vm39_vm0, %v26_v26 }
  0x22   :  { %233 = vmatpush.msrb.mxu2 %v105_v13  ;;  %255 = vmatpush.msra.mxu3 %v108_v9 }
  0x24   :  { %256 = vmatpush.msra.mxu3 %v107_v10 }
  0x26   :  { %257 = vmatpush.msra.mxu3 %v106_v12 }
  0x28   :  { %258 = vmatpush.msra.mxu3 %v105_v13 }
  0x29   :  { %340 = vmatmul.msk.f32.gmra.mxu0 %vm39_vm0, %v27_v32 }
  0x31   :  { %341 = vmatmul.msk.f32.gmra.mxu0 %vm39_vm0, %v28_v40 }
  0x86   :  { %v81_v15 = vpop.f32.mrf.mxu0 }
  0x87   :  { %v82_v16 = vadd.f32 %v481_v14, %v81_v15 }
  0x89   :  { %359 = vtanh.f32 %v82_v16 }
  0x8e   :  { %v84_v20 = vpop.f32.mrf.mxu0  ;;  %v99_v33 = vpop.f32.mrf.mxu3 }
  0x8f   :  { %v360_v17 = vpop.eup %359  ;;  %v85_v21 = vadd.f32 %v481_v14, %v84_v20  ;;  %v100_v54 = vadd.f32 %v481_v14, %v99_v33 }
  0x90   :  { %344 = vmatmul.msk.f32.vlgmr.msra.gmra.mxu1 %vm114_vm1, %v360_v17 }
  0x91   :  { %276 = vmatpush.msra.mxu1 %v422_v2 }
  0x93   :  { %277 = vmatpush.msra.mxu1 %v431_v4 }
  0x95   :  { %278 = vmatpush.msra.mxu1 %v437_v5 }
  0x96   :  { %v87_v27 = vpop.f32.mrf.mxu0  ;;  %v102_v34 = vpop.f32.mrf.mxu3 }
  0x97   :  { %279 = vmatpush.msra.mxu1 %v109_v8  ;;  %v88_v28 = vadd.f32 %v481_v14, %v87_v27  ;;  %v103_v63 = vadd.f32 %v481_v14, %v102_v34 }
  0x99   :  { %280 = vmatpush.msra.mxu1 %v108_v9 }
  0x9b   :  { %281 = vmatpush.msra.mxu1 %v107_v10 }
  0x9d   :  { %282 = vmatpush.msra.mxu1 %v106_v12 }
  0x9e   :  { %v90_v35 = vpop.f32.mrf.mxu0 }
  0x9f   :  { %283 = vmatpush.msra.mxu1 %v105_v13  ;;  %v91_v36 = vadd.f32 %v481_v14, %v90_v35 }
  0xa6   :  { %v93_v41 = vpop.f32.mrf.mxu0 }
  0xa7   :  { %v94_v42 = vadd.f32 %v481_v14, %v93_v41 }
  0xae   :  { %v96_v46 = vpop.f32.mrf.mxu0 }
  0xaf   :  { %v97_v47 = vadd.f32 %v481_v14, %v96_v46 }
 0x10d   :  { %v135_v22 = vpop.f32.mrf.mxu1 }
 0x10e   :  { %v138_v23 = vadd.f32 %v135_v22, %v85_v21 }
 0x110   :  { %361 = vtanh.f32 %v138_v23 }
 0x116   :  { %v362_v24 = vpop.eup %361 }
 0x117   :  { %345 = vmatmul.msk.f32.vlgmr.msra.gmra.mxu2 %vm114_vm1, %v362_v24 }
 0x118   :  { %313 = vmatpush.msra.mxu2 %v297_v51 }
 0x11a   :  { %314 = vmatpush.msra.mxu2 %v296_v52 }
 0x11c   :  { %315 = vmatpush.msra.mxu2 %v295_v53 }
 0x11e   :  { %316 = vmatpush.msra.mxu2 %v294_v58 }
 0x120   :  { %317 = vmatpush.msra.mxu2 %v293_v59 }
 0x122   :  { %318 = vmatpush.msra.mxu2 %v292_v60 }
 0x124   :  { %319 = vmatpush.msra.mxu2 %v291_v61 }
 0x126   :  { %320 = vmatpush.msra.mxu2 %v290_v62 }
 0x19a   :  { %v160_v29 = vpop.f32.mrf.mxu2 }
 0x19b   :  { %v163_v30 = vadd.f32 %v160_v29, %v88_v28 }
 0x19d   :  { %363 = vtanh.f32 %v163_v30 }
 0x1a3   :  { %v364_v31 = vpop.eup %363 }
 0x1a4   :  { %346 = vmatmul.msk.f32.vlgmr.msrb.gmra.mxu3 %vm114_vm1, %v364_v31 }
 0x227   :  { %v185_v37 = vpop.f32.mrf.mxu3 }
 0x228   :  { %v188_v38 = vadd.f32 %v185_v37, %v91_v36 }
 0x22a   :  { %365 = vtanh.f32 %v188_v38 }
 0x230   :  { %v366_v39 = vpop.eup %365 }
 0x231   :  { %347 = vmatmul.msk.f32.vlgmr.msrb.gmra.mxu1 %vm114_vm1, %v366_v39 }
 0x2ae   :  { %v210_v43 = vpop.f32.mrf.mxu1 }
 0x2af   :  { %v213_v44 = vadd.f32 %v210_v43, %v94_v42 }
 0x2b1   :  { %367 = vtanh.f32 %v213_v44 }
 0x2b7   :  { %v368_v45 = vpop.eup %367 }
 0x2b8   :  { %348 = vmatmul.msk.f32.vlgmr.msrb.gmra.mxu2 %vm114_vm1, %v368_v45 }
 0x33b   :  { %v235_v48 = vpop.f32.mrf.mxu2 }
 0x33c   :  { %v238_v49 = vadd.f32 %v235_v48, %v97_v47 }
 0x33e   :  { %369 = vtanh.f32 %v238_v49 }
 0x344   :  { %v370_v50 = vpop.eup %369 }
 0x345   :  { %349 = vmatmul.msk.f32.vlgmr.msra.gmra.mxu3 %vm114_vm1, %v370_v50 }
 0x3c8   :  { %v260_v55 = vpop.f32.mrf.mxu3 }
 0x3c9   :  { %v263_v56 = vadd.f32 %v260_v55, %v100_v54 }
 0x3cb   :  { %371 = vtanh.f32 %v263_v56 }
 0x3d1   :  { %v372_v57 = vpop.eup %371 }
 0x3d2   :  { %350 = vmatmul.msk.f32.vlgmr.msra.gmra.mxu1 %vm114_vm1, %v372_v57 }
 0x44f   :  { %v285_v0 = vpop.f32.mrf.mxu1 }
 0x450   :  { %v288_v1 = vadd.f32 %v285_v0, %v103_v63 }
 0x452   :  { %373 = vtanh.f32 %v288_v1 }
 0x458   :  { %v374_v2 = vpop.eup %373 }
 0x459   :  { %351 = vmatmul.msk.f32.vlgmr.msra.gmra.mxu2 %vm114_vm1, %v374_v2 }
 0x4dc   :  { %v322_v4 = vpop.f32.mrf.mxu2 }
 0x4dd   :  { %v323_v5 = vadd.f32 %v358_v3, %v322_v4 }
 0x4df   :  { %375 = vtanh.f32 %v323_v5 }
 0x4e5   :  { %v376_v6 = vpop.eup %375 }
 0x4e6   :  { %327 = vrot.lane.b32.xlu0 %v376_v6, %s377_s26 }
 0x558   :  { %v328_v7 = vpop.permute.xlu0 %327 }
 0x559   :  { %v330_v8 = vsel %vm114_vm1, %v374_v2, %v328_v7 }
 0x55a   :  { %331 = vst [vmem:[%s566_s6] sm:$0xff] %v330_v8 }

</bundles_post_ra>
